<compile_context>
chip_gen: v7x
topology: tpu7x:2x2x1
jax: 0.10.0
libtpu: 0.0.40
codegen_flags: <defaults>
</compile_context>

<pallas_src>
import functools

import jax
import jax.numpy as jnp
from jax import lax
from jax.experimental import pallas as pl
from jax.experimental.pallas import tpu as pltpu


def _shift_rows_up(x, j):
    """Circular shift along sublanes: result[r] = x[(r + j) mod rows].

    Written explicitly as slice + concat (proven lowering); wrapped rows only
    ever land in positions that the pooling mask discards.
    TODO(synk): switch to pltpu.roll(x, rows - j, axis=0) once the XLU path is
    validated on-device; semantics are identical.
    """
    if j == 0:
        return x
    return jnp.concatenate([x[j:, :], x[:j, :]], axis=0)


def _fused_embed_conv_pool_relu_kernel(*refs, kernel_sizes, batch_block,
                                       seq_len, emb_dim, num_emb):
    """One grid step: `batch_block` token rows -> (batch_block, sum_C).

    refs = (ids_ref, table_ref, w_ref_0..w_ref_{nb-1}, bias_ref, out_ref)
      ids_ref  : (Bb*L, 1)        int32  flattened token ids (only HBM stream)
      table_ref: (num_emb, E)     bf16   resident embedding table
      w_ref_i  : (k_i*E, C_i)     bf16   im2col-layout conv weight
      bias_ref : (1, sum_C)       f32    concatenated conv biases
      out_ref  : (Bb, sum_C)      f32    relu(maxpool(conv) + bias)
    """
    nb = len(kernel_sizes)
    ids_ref = refs[0]
    table_ref = refs[1]
    w_refs = refs[2:2 + nb]
    bias_ref = refs[2 + nb]
    out_ref = refs[3 + nb]

    n_rows = batch_block * seq_len

    # ---- In-kernel embedding gather: one-hot bf16 matmul on the MXU. ----
    ids = ids_ref[...]                                          # (Bb*L, 1) i32
    vocab_iota = lax.broadcasted_iota(jnp.int32, (n_rows, num_emb), 1)
    onehot = jnp.where(vocab_iota == ids, 1.0, 0.0).astype(jnp.bfloat16)
    # One nonzero bf16 term per row -> exact bf16 table rows after the cast.
    flat = jnp.dot(onehot, table_ref[...],
                   preferred_element_type=jnp.float32).astype(jnp.bfloat16)
    # flat: (Bb*L, E) bf16 embedded tokens, never materialized in HBM.

    pooled_banks = []
    for w_ref, k in zip(w_refs, kernel_sizes):
        lout = seq_len - k + 1                       # valid positions per row
        c = w_ref.shape[-1]
        # Per-tap accumulation: bf16 x bf16 MXU dot with f32 accumulation,
        # aligning taps by shifting the small (rows, C_i) f32 partial sums.
        acc = None
        for j in range(k):
            p = jnp.dot(flat, w_ref[j * emb_dim:(j + 1) * emb_dim, :],
                        preferred_element_type=jnp.float32)     # (Bb*L, C_i)
            p = _shift_rows_up(p, j)                 # p[r] <- tap_j at r + j
            acc = p if acc is None else acc + p
        # Single masked reduction per bank: positions t >= lout (row-crossing
        # windows AND circular-wrap rows, which all satisfy t >= lout) -> -inf.
        acc3 = acc.reshape(batch_block, seq_len, c)
        t_idx = lax.broadcasted_iota(jnp.int32, acc3.shape, 1)
        masked = jnp.where(t_idx < lout, acc3, -jnp.inf)
        pooled_banks.append(jnp.max(masked, axis=1))             # (Bb, C_i)

    pooled = jnp.concatenate(pooled_banks, axis=-1)              # (Bb, sum_C)
    # Bias is time-invariant: adding it after the pool is exact.
    out_ref[...] = jnp.maximum(pooled + bias_ref[...], 0.0).astype(out_ref.dtype)
    # TODO(synk): if production sum_C stays << 128 lanes, write a lane-padded
    # (Bb, 128*ceil(sum_C/128)) slab and slice in JAX to avoid masked vst.


def _vmem_limit_bytes():
    """Per-generation scoped-VMEM limit: ~48 MiB on 64-MiB parts (v7x-class),
    ~96 MiB on 128-MiB parts (v5e/v6e); conservative 32 MiB if unknown."""
    try:
        phys = pltpu.get_tpu_info().vmem_capacity_bytes
    except Exception:
        return 32 * 1024 * 1024
    if phys <= 64 * 1024 * 1024:
        return 48 * 1024 * 1024
    return 96 * 1024 * 1024


def _pick_batch_block(batch, seq_len, emb_dim, num_emb, sum_c, vmem_budget):
    """Largest batch block (multiple of 8, dividing batch) whose in-kernel
    intermediates fit the scoped-VMEM budget, preferring >= 2 grid steps so
    both v7x TensorCores get work under "parallel" semantics."""
    if batch % 8 != 0:
        return batch                     # sublane rule: block must equal batch
    # Rough live bytes/token: bf16 emb + lane-padded one-hot + f32 gather
    # result + f32 tap/acc products.
    per_token = 2 * emb_dim + 2 * max(num_emb, 128) + 4 * emb_dim + 8 * sum_c
    budget = max(vmem_budget // 2, 1)    # headroom for pipelining / scratch
    bb_cap = max(8, (budget // max(per_token * seq_len, 1)) // 8 * 8)
    target = batch if batch < 16 else max(8, (batch // 2) // 8 * 8)
    bb = int(min(bb_cap, target, batch))
    while bb > 8 and batch % bb != 0:
        bb -= 8
    return bb if bb >= 8 and batch % bb == 0 else batch


def fused_embed_conv_pool_relu(ids_flat, table, w_list, bias, kernel_sizes,
                               batch, seq_len):
    """ids_flat: (B*L, 1) i32; table: (V, E) bf16; w_list[i]: (k_i*E, C_i) bf16;
    bias: (1, sum_C) f32.  Returns (B, sum_C) f32 in a single pallas_call."""
    n_tokens = ids_flat.shape[0]
    assert n_tokens == batch * seq_len
    num_emb, emb_dim = table.shape
    sum_c = bias.shape[-1]
    assert seq_len >= max(kernel_sizes), "seq_len must cover the largest kernel"
    # Resident table must fit comfortably in VMEM alongside the activations.
    assert num_emb * emb_dim * 2 <= 4 * 1024 * 1024, (
        "embedding table too large to keep resident")
    # TODO(synk): page the table through VMEM for very large vocabularies.

    vmem_limit = _vmem_limit_bytes()
    bb = _pick_batch_block(batch, seq_len, emb_dim, num_emb, sum_c, vmem_limit)
    grid = (batch // bb,)

    in_specs = [
        pl.BlockSpec((bb * seq_len, 1), lambda i: (i, 0)),    # token ids
        pl.BlockSpec((num_emb, emb_dim), lambda i: (0, 0)),   # resident table
    ]
    for w in w_list:
        ke, c = w.shape
        in_specs.append(pl.BlockSpec((ke, c), lambda i: (0, 0)))
    in_specs.append(pl.BlockSpec((1, sum_c), lambda i: (0, 0)))
    # TODO(synk): pipeline_mode=pl.Buffered(1) on the resident table/weights/bias
    # would reclaim a little VMEM (they revisit block (0,0) every step).

    kernel = functools.partial(
        _fused_embed_conv_pool_relu_kernel,
        kernel_sizes=tuple(kernel_sizes), batch_block=bb,
        seq_len=seq_len, emb_dim=emb_dim, num_emb=num_emb)

    return pl.pallas_call(
        kernel,
        out_shape=jax.ShapeDtypeStruct((batch, sum_c), jnp.float32),
        grid_spec=pltpu.PrefetchScalarGridSpec(
            num_scalar_prefetch=0,
            grid=grid,
            in_specs=in_specs,
            out_specs=pl.BlockSpec((bb, sum_c), lambda i: (i, 0)),
        ),
        compiler_params=pltpu.CompilerParams(
            dimension_semantics=("parallel",),
            vmem_limit_bytes=vmem_limit,
        ),
    )(ids_flat, table, *w_list, bias)


def init_params(key, num_emb, emb_dim, padding_idx, kernel_sizes, out_channels):
    keys = jax.random.split(key, 1 + 2 * len(kernel_sizes))
    emb_w = jax.random.normal(keys[0], (num_emb, emb_dim), jnp.float32)
    emb_w = emb_w.at[padding_idx].set(0.0)           # padding_idx row zeroed
    convs = []
    for i, (ksz, c) in enumerate(zip(kernel_sizes, out_channels)):
        fan_in = emb_dim * ksz
        bound = 1.0 / (fan_in ** 0.5)
        w = jax.random.uniform(keys[1 + 2 * i], (c, emb_dim, ksz),
                               jnp.float32, -bound, bound)   # PyTorch (C, E, k)
        b = jax.random.uniform(keys[2 + 2 * i], (c,),
                               jnp.float32, -bound, bound)
        convs.append((w, b))
    return emb_w, convs


def prepare_params(emb_w, convs):
    """One-time re-layout for the kernel:
    embedding table -> bf16; Conv1d (C, E, k) -> (k*E, C) bf16 per bank;
    biases -> one concatenated f32 (1, sum_C)."""
    table = emb_w.astype(jnp.bfloat16)
    w_list, b_parts = [], []
    for w, b in convs:
        c, e, k = w.shape
        w_list.append(jnp.transpose(w, (2, 1, 0)).reshape(k * e, c)
                      .astype(jnp.bfloat16))
        b_parts.append(b)
    bias = jnp.concatenate(b_parts).reshape(1, -1).astype(jnp.float32)
    return table, w_list, bias


def authors_cnn_forward(x, table, w_list, bias, kernel_sizes):
    batch, seq_len = x.shape
    # Only the int32 ids leave the wrapper: the (B, L, E) activations are
    # never materialized in HBM (gather fused into the kernel).
    ids_flat = x.reshape(batch * seq_len, 1).astype(jnp.int32)
    out = fused_embed_conv_pool_relu(ids_flat, table, w_list, bias,
                                     kernel_sizes, batch, seq_len)  # (B, sum_C)
    return out[:, None, :]                                          # (B,1,sum_C)


def reference_forward(x, emb_w, convs):
    # Pure-JAX reference with the same bf16 rounding of embeddings/weights as
    # the kernel (f32 math), so tolerances stay tight.
    emb = jnp.take(emb_w, x, axis=0).astype(jnp.bfloat16).astype(jnp.float32)
    outs = []
    for w, b in convs:
        c, e, k = w.shape
        w32 = w.astype(jnp.bfloat16).astype(jnp.float32)
        bsz, seq_len, _ = emb.shape
        lout = seq_len - k + 1
        cols = jnp.stack([emb[:, j:j + lout, :] for j in range(k)], axis=-1)
        y = jnp.einsum('blek,cek->blc', cols, w32)
        y = jnp.max(y, axis=1, keepdims=True) + b[None, None, :]
        outs.append(y)
    return jnp.maximum(jnp.concatenate(outs, axis=-1), 0.0)


if __name__ == "__main__":
    # Small synthetic config consistent with the module.
    num_author_embeddings = 50
    author_embedding_dim = 32
    padding_idx = 0
    kernel_sizes = (2, 3)
    out_channels = (8, 16)
    batch, seq_len = 2, 16

    key = jax.random.PRNGKey(0)
    k_param, k_idx = jax.random.split(key)
    emb_w, convs = init_params(k_param, num_author_embeddings,
                               author_embedding_dim, padding_idx,
                               kernel_sizes, out_channels)
    table, w_list, bias = prepare_params(emb_w, convs)
    x = jax.random.randint(k_idx, (batch, seq_len), 0, num_author_embeddings,
                           dtype=jnp.int32)

    out = authors_cnn_forward(x, table, w_list, bias, kernel_sizes)
    out = jax.block_until_ready(out)

    ref = reference_forward(x, emb_w, convs)
    assert out.shape == (batch, 1, sum(out_channels)), out.shape
    assert jnp.allclose(out, ref, atol=1e-3, rtol=1e-3), "mismatch vs reference"

    print("KERNEL_OK")
</pallas_src>

<mosaic_0001>
module attributes {stable_mosaic.version = 11 : i64} {
  func.func @_fused_embed_conv_pool_relu_kernel(%arg0: i32, %arg1: memref<32x1xi32, #tpu.memory_space<vmem>>, %arg2: memref<50x32xbf16, #tpu.memory_space<vmem>>, %arg3: memref<64x8xbf16, #tpu.memory_space<vmem>>, %arg4: memref<96x16xbf16, #tpu.memory_space<vmem>>, %arg5: memref<1x24xf32, #tpu.memory_space<vmem>>, %arg6: memref<2x24xf32, #tpu.memory_space<vmem>>) attributes {dimension_semantics = [#tpu.dimension_semantics<parallel>], iteration_bounds = array<i64: 1>, scalar_prefetch = 0 : i64, scratch_operands = 0 : i64, tpu.core_type = #tpu.core_type<tc>, window_params = [{transform_indices = @transform_0, window_bounds = array<i64: 32, 1>}, {pipeline_mode = #tpu.pipeline_mode<synchronous>, transform_indices = @transform_1, window_bounds = array<i64: 50, 32>}, {pipeline_mode = #tpu.pipeline_mode<synchronous>, transform_indices = @transform_2, window_bounds = array<i64: 64, 8>}, {pipeline_mode = #tpu.pipeline_mode<synchronous>, transform_indices = @transform_3, window_bounds = array<i64: 96, 16>}, {pipeline_mode = #tpu.pipeline_mode<synchronous>, transform_indices = @transform_4, window_bounds = array<i64: 1, 24>}, {transform_indices = @transform_5, window_bounds = array<i64: 2, 24>}]} {
    %c0 = arith.constant 0 : index
    %c0_0 = arith.constant 0 : index
    %0 = vector.load %arg1[%c0, %c0_0] : memref<32x1xi32, #tpu.memory_space<vmem>>, vector<32x1xi32>
    %1 = tpu.iota {dimensions = array<i32: 1>} : vector<32x50xi32>
    %2 = vector.broadcast %0 : vector<32x1xi32> to vector<32x50xi32>
    %3 = arith.cmpi eq, %1, %2 : vector<32x50xi32>
    %cst = arith.constant 1.000000e+00 : f32
    %cst_1 = arith.constant 0.000000e+00 : f32
    %4 = vector.broadcast %cst : f32 to vector<32x50xf32>
    %5 = vector.broadcast %cst_1 : f32 to vector<32x50xf32>
    %6 = arith.select %3, %4, %5 : vector<32x50xi1>, vector<32x50xf32>
    %7 = arith.truncf %6 : vector<32x50xf32> to vector<32x50xbf16>
    %c0_2 = arith.constant 0 : index
    %c0_3 = arith.constant 0 : index
    %8 = vector.load %arg2[%c0_2, %c0_3] : memref<50x32xbf16, #tpu.memory_space<vmem>>, vector<50x32xbf16>
    %cst_4 = arith.constant dense<0.000000e+00> : vector<32x32xf32>
    %9 = tpu.matmul %7, %8, %cst_4 {dimension_numbers = #tpu.dot_dimension_numbers<[1], [0], [0], [1], [0, 0, 1, 1], [], []>} : vector<32x50xbf16>, vector<50x32xbf16>, vector<32x32xf32> -> vector<32x32xf32>
    %10 = arith.truncf %9 : vector<32x32xf32> to vector<32x32xbf16>
    %c0_5 = arith.constant 0 : index
    %c0_6 = arith.constant 0 : index
    %11 = vector.load %arg3[%c0_5, %c0_6] : memref<64x8xbf16, #tpu.memory_space<vmem>>, vector<32x8xbf16>
    %cst_7 = arith.constant dense<0.000000e+00> : vector<32x8xf32>
    %12 = tpu.matmul %10, %11, %cst_7 {dimension_numbers = #tpu.dot_dimension_numbers<[1], [0], [0], [1], [0, 0, 1, 1], [], []>} : vector<32x32xbf16>, vector<32x8xbf16>, vector<32x8xf32> -> vector<32x8xf32>
    %c32 = arith.constant 32 : index
    %c0_8 = arith.constant 0 : index
    %13 = vector.load %arg3[%c32, %c0_8] : memref<64x8xbf16, #tpu.memory_space<vmem>>, vector<32x8xbf16>
    %cst_9 = arith.constant dense<0.000000e+00> : vector<32x8xf32>
    %14 = tpu.matmul %10, %13, %cst_9 {dimension_numbers = #tpu.dot_dimension_numbers<[1], [0], [0], [1], [0, 0, 1, 1], [], []>} : vector<32x32xbf16>, vector<32x8xbf16>, vector<32x8xf32> -> vector<32x8xf32>
    %15 = vector.extract_strided_slice %14 {offsets = [1, 0], sizes = [31, 8], strides = [1, 1]} : vector<32x8xf32> to vector<31x8xf32>
    %16 = vector.extract_strided_slice %14 {offsets = [0, 0], sizes = [1, 8], strides = [1, 1]} : vector<32x8xf32> to vector<1x8xf32>
    %17 = tpu.concatenate %15, %16 in 0 : vector<31x8xf32>, vector<1x8xf32> -> vector<32x8xf32>
    %18 = arith.addf %12, %17 : vector<32x8xf32>
    %19 = vector.shape_cast %18 : vector<32x8xf32> to vector<2x16x8xf32>
    %20 = tpu.iota {dimensions = array<i32: 1>} : vector<2x16x8xi32>
    %c15_i32 = arith.constant 15 : i32
    %21 = vector.broadcast %c15_i32 : i32 to vector<2x16x8xi32>
    %22 = arith.cmpi slt, %20, %21 : vector<2x16x8xi32>
    %cst_10 = arith.constant 0xFF800000 : f32
    %23 = vector.broadcast %cst_10 : f32 to vector<2x16x8xf32>
    %24 = arith.select %22, %19, %23 : vector<2x16x8xi1>, vector<2x16x8xf32>
    %cst_11 = arith.constant dense<0xFF800000> : vector<2x8xf32>
    %25 = vector.multi_reduction <maximumf>, %24, %cst_11 [1] : vector<2x16x8xf32> to vector<2x8xf32>
    %c0_12 = arith.constant 0 : index
    %c0_13 = arith.constant 0 : index
    %26 = vector.load %arg4[%c0_12, %c0_13] : memref<96x16xbf16, #tpu.memory_space<vmem>>, vector<32x16xbf16>
    %cst_14 = arith.constant dense<0.000000e+00> : vector<32x16xf32>
    %27 = tpu.matmul %10, %26, %cst_14 {dimension_numbers = #tpu.dot_dimension_numbers<[1], [0], [0], [1], [0, 0, 1, 1], [], []>} : vector<32x32xbf16>, vector<32x16xbf16>, vector<32x16xf32> -> vector<32x16xf32>
    %c32_15 = arith.constant 32 : index
    %c0_16 = arith.constant 0 : index
    %28 = vector.load %arg4[%c32_15, %c0_16] : memref<96x16xbf16, #tpu.memory_space<vmem>>, vector<32x16xbf16>
    %cst_17 = arith.constant dense<0.000000e+00> : vector<32x16xf32>
    %29 = tpu.matmul %10, %28, %cst_17 {dimension_numbers = #tpu.dot_dimension_numbers<[1], [0], [0], [1], [0, 0, 1, 1], [], []>} : vector<32x32xbf16>, vector<32x16xbf16>, vector<32x16xf32> -> vector<32x16xf32>
    %30 = vector.extract_strided_slice %29 {offsets = [1, 0], sizes = [31, 16], strides = [1, 1]} : vector<32x16xf32> to vector<31x16xf32>
    %31 = vector.extract_strided_slice %29 {offsets = [0, 0], sizes = [1, 16], strides = [1, 1]} : vector<32x16xf32> to vector<1x16xf32>
    %32 = tpu.concatenate %30, %31 in 0 : vector<31x16xf32>, vector<1x16xf32> -> vector<32x16xf32>
    %33 = arith.addf %27, %32 : vector<32x16xf32>
    %c64 = arith.constant 64 : index
    %c0_18 = arith.constant 0 : index
    %34 = vector.load %arg4[%c64, %c0_18] : memref<96x16xbf16, #tpu.memory_space<vmem>>, vector<32x16xbf16>
    %cst_19 = arith.constant dense<0.000000e+00> : vector<32x16xf32>
    %35 = tpu.matmul %10, %34, %cst_19 {dimension_numbers = #tpu.dot_dimension_numbers<[1], [0], [0], [1], [0, 0, 1, 1], [], []>} : vector<32x32xbf16>, vector<32x16xbf16>, vector<32x16xf32> -> vector<32x16xf32>
    %36 = vector.extract_strided_slice %35 {offsets = [2, 0], sizes = [30, 16], strides = [1, 1]} : vector<32x16xf32> to vector<30x16xf32>
    %37 = vector.extract_strided_slice %35 {offsets = [0, 0], sizes = [2, 16], strides = [1, 1]} : vector<32x16xf32> to vector<2x16xf32>
    %38 = tpu.concatenate %36, %37 in 0 : vector<30x16xf32>, vector<2x16xf32> -> vector<32x16xf32>
    %39 = arith.addf %33, %38 : vector<32x16xf32>
    %40 = vector.shape_cast %39 : vector<32x16xf32> to vector<2x16x16xf32>
    %41 = tpu.iota {dimensions = array<i32: 1>} : vector<2x16x16xi32>
    %c14_i32 = arith.constant 14 : i32
    %42 = vector.broadcast %c14_i32 : i32 to vector<2x16x16xi32>
    %43 = arith.cmpi slt, %41, %42 : vector<2x16x16xi32>
    %cst_20 = arith.constant 0xFF800000 : f32
    %44 = vector.broadcast %cst_20 : f32 to vector<2x16x16xf32>
    %45 = arith.select %43, %40, %44 : vector<2x16x16xi1>, vector<2x16x16xf32>
    %cst_21 = arith.constant dense<0xFF800000> : vector<2x16xf32>
    %46 = vector.multi_reduction <maximumf>, %45, %cst_21 [1] : vector<2x16x16xf32> to vector<2x16xf32>
    %47 = tpu.concatenate %25, %46 in 1 : vector<2x8xf32>, vector<2x16xf32> -> vector<2x24xf32>
    %c0_22 = arith.constant 0 : index
    %c0_23 = arith.constant 0 : index
    %48 = vector.load %arg5[%c0_22, %c0_23] : memref<1x24xf32, #tpu.memory_space<vmem>>, vector<1x24xf32>
    %49 = vector.broadcast %48 : vector<1x24xf32> to vector<2x24xf32>
    %50 = arith.addf %47, %49 : vector<2x24xf32>
    %cst_24 = arith.constant 0.000000e+00 : f32
    %51 = vector.broadcast %cst_24 : f32 to vector<2x24xf32>
    %52 = arith.maximumf %50, %51 : vector<2x24xf32>
    %c0_25 = arith.constant 0 : index
    %c0_26 = arith.constant 0 : index
    %53 = vector.load %arg6[%c0_25, %c0_26] : memref<2x24xf32, #tpu.memory_space<vmem>>, vector<2x24xf32>
    tpu.vector_store %arg6[%c0_25, %c0_26], %52 {strides = array<i32>} : memref<2x24xf32, #tpu.memory_space<vmem>>, vector<2x24xf32>,
    return
  }
  func.func @transform_0(%arg0: i32) -> (i32, i32) {
    %c0_i32 = arith.constant 0 : i32
    %c0_i32_0 = arith.constant 0 : i32
    return %arg0, %c0_i32 : i32, i32
  }
  func.func @transform_1(%arg0: i32) -> (i32, i32) {
    %c0_i32 = arith.constant 0 : i32
    %c0_i32_0 = arith.constant 0 : i32
    %c0_i32_1 = arith.constant 0 : i32
    return %c0_i32, %c0_i32_0 : i32, i32
  }
  func.func @transform_2(%arg0: i32) -> (i32, i32) {
    %c0_i32 = arith.constant 0 : i32
    %c0_i32_0 = arith.constant 0 : i32
    %c0_i32_1 = arith.constant 0 : i32
    return %c0_i32, %c0_i32_0 : i32, i32
  }
  func.func @transform_3(%arg0: i32) -> (i32, i32) {
    %c0_i32 = arith.constant 0 : i32
    %c0_i32_0 = arith.constant 0 : i32
    %c0_i32_1 = arith.constant 0 : i32
    return %c0_i32, %c0_i32_0 : i32, i32
  }
  func.func @transform_4(%arg0: i32) -> (i32, i32) {
    %c0_i32 = arith.constant 0 : i32
    %c0_i32_0 = arith.constant 0 : i32
    %c0_i32_1 = arith.constant 0 : i32
    return %c0_i32, %c0_i32_0 : i32, i32
  }
  func.func @transform_5(%arg0: i32) -> (i32, i32) {
    %c0_i32 = arith.constant 0 : i32
    %c0_i32_0 = arith.constant 0 : i32
    return %arg0, %c0_i32 : i32, i32
  }
}

</mosaic_0001>

<bundles_post_ra>
// kernel: tpu_custom_call.1
= control target key start
LH: loop header
LB: loop body
LE: loop exit
PB: predicated region body
PF: predicated region fallthrough
CT: control target
= control target key end

     0   :  { %v769_v2 = vmov 0   ;;  %vm85_vm0 = vcmask 1040384   ;;  %s905_s0 = inlined_call_operand.vmem [shape: s32[32,1], index: 0, kind: input, shape index: {}]   ;;  %s906_s1 = inlined_call_operand.vmem [shape: bf16[50,32], index: 1, kind: input, shape index: {}]   ;;  %s907_s2 = inlined_call_operand.vmem [shape: bf16[64,8], index: 2, kind: input, shape index: {}]   ;;  %s908_s3 = inlined_call_operand.vmem [shape: bf16[96,16], index: 3, kind: input, shape index: {}]   ;;  %s909_s4 = inlined_call_operand.vmem [shape: f32[1,24], index: 4, kind: input, shape index: {}]   ;;  %s910_s5 = inlined_call_operand.hbm [shape: f32[2,24], index: 5, kind: output, shape index: {}]  }
   0x1   :  { %v24_v0 = vld [vmem:[%s905_s0 + $0x10] sm:$0xff]  ;;  %v22_v1 = vld [vmem:[%s905_s0] sm:$0xff]  ;;  %730 = vset.pattern.permute.xlu1 %v769_v2  ;;  %729 = vset.pattern.permute.xlu0 %v769_v2  ;;  %v25_v3 = vld [vmem:[%s905_s0 + $0x18] sm:$0xff] }
   0x2   :  { %v23_v4 = vld [vmem:[%s905_s0 + $0x8] sm:$0xff]  ;;  %35 = vperm.xlu1 %730, %v24_v0   ;;  %29 = vperm.xlu0 %729, %v22_v1   ;;  %v731_v5 = vld [vmem:[%s906_s1] sm:$0xff]   ;;  %v733_v7 = vld [vmem:[%s906_s1 + $0x10] sm:$0xff]  }
   0x3   :  { %v732_v6 = vld [vmem:[%s906_s1 + $0x8] sm:$0xff]   ;;  %672 = vmatprep.subr.bf16.mxu0 %v731_v5  ;;  %v734_v8 = vld [vmem:[%s906_s1 + $0x18] ss:$0 sps:$4 sm:$0x11]   ;;  %v735_v9 = vld [vmem:[%s907_s2 + $0x10] sm:$0xff]  }
   0x4   :  { %673 = vmatpush3.bf16.msra.mxu0 %v731_v5  ;;  %684 = vmatprep.subr.bf16.mxu1 %v735_v9 }
   0x5   :  { %674 = vmatprep.subr.bf16.mxu0 %v732_v6 }
   0x6   :  { %38 = vperm.xlu1 %730, %v25_v3   ;;  %32 = vperm.xlu0 %729, %v23_v4  }
   0x8   :  { %675 = vmatpush3.bf16.msra.mxu0 %v732_v6 }
   0x9   :  { %676 = vmatprep.subr.bf16.mxu0 %v733_v7 }
   0xc   :  { %677 = vmatpush3.bf16.msra.mxu0 %v733_v7 }
   0xd   :  { %10 = vsyncpa [#allocation3], 0  ;;  %724 = vmatprep.subr.msk.bf16.mxu0 %vm85_vm0, %v734_v8  ;;  %v87_v10 = vsel %vm85_vm0, %v734_v8, 0  ;;  %685 = vmatpush3.bf16.msra.mxu1 %v735_v9  ;;  %v736_v11 = vld [vmem:[%s908_s3 + $0x10] sm:$0xff]   ;;  %v26_v12 = vlaneseq  ;;  %vm78_vm5 = vcmask 408576   ;;  %v770_v18 = vmov 0.0  }
   0xe   :  { %v737_v25 = vld [vmem:[%s907_s2 + $0x18] sm:$0xff]   ;;  %v739_v27 = vld [vmem:[%s907_s2] sm:$0xff]   ;;  %vm160_vm6 = vcmask 261120   ;;  %v741_v35 = vld [vmem:[%s907_s2 + $0x8] sm:$0xff]   ;;  %vm220_vm7 = vcmask 1046528   ;;  %vm304_vm8 = vcmask 64512  }
   0xf   :  { %v27_v13 = vand.u32 127, %v26_v12  ;;  %v738_v26 = vld [vmem:[%s908_s3 + $0x18] sm:$0xff]   ;;  %686 = vmatprep.subr.bf16.mxu1 %v737_v25  ;;  %v740_v28 = vld [vmem:[%s908_s3 + $0x20] sm:$0xff]   ;;  %v742_v36 = vld [vmem:[%s908_s3 + $0x28] sm:$0xff]   ;;  %v296_v41 = vshrl.u32 %v26_v12, 7  ;;  %vm539_vm10 = vcmask 1045504  }
  0x10   :  { %679 = vmatpush3.bf16.msra.mxu0 %v87_v10  ;;  %v743_v37 = vld [vmem:[%s908_s3] sm:$0xff]   ;;  %v744_v38 = vld [vmem:[%s908_s3 + $0x8] sm:$0xff]   ;;  %vm563_vm12 = vcmask 130048   ;;  %vm584_vm13 = vcmask 1041409   ;;  %s771_s3 = smov 8   ;;  %s772_s28 = smov [#allocation2]  }
  0x11   :  { %700 = vmatprep.subr.bf16.mxu0 %v736_v11  ;;  %687 = vmatpush3.bf16.msra.mxu1 %v737_v25  ;;  %v869_v56 = vadd.s32 8, %v296_v41  ;;  %s611_s29 = sshll.u32 %s772_s28, 4  ;;  %vm603_vm14 = vcmask 189440   ;;  %s612_s29 = int_to_ptr.vmem [resolvable:$true] %s611_s29 }
  0x12   :  { %692 = vmatprep.subr.bf16.mxu1 %v739_v27  ;;  %s745_s30 = scalar_lea.vmem %s612_s29, 32  ;;  %p750_p1 = scmp.lt.s32.totalorder %s612_s29, %s612_s29 }
  0x13   :  { %vm299_vm9 = vcmp.lt.s32.totalorder %v869_v56, 15  ;;  %vm558_vm11 = vcmp.lt.s32.totalorder %v869_v56, 14  ;;  %p746_p0 = scmp.ne.s32.totalorder %s612_s29, %s745_s30  ;;  %p751_p2 = scmp.lt.s32.totalorder %s745_s30, %s745_s30 }
  0x15   :  { %p752_p3 = por %p751_p2, %p750_p1 }
  0x17   :  { %p753_p4 = pnand %p752_p3, %p746_p0 }
  0x81   :  { %v36_v14 = vpop.permute.xlu1 %35  ;;  %v30_v15 = vpop.permute.xlu0 %29 }
  0x82   :  { %vm42_vm1 = vcmp.eq.s32.totalorder %v27_v13, %v36_v14  ;;  %vm40_vm2 = vcmp.eq.s32.totalorder %v27_v13, %v30_v15 }
  0x83   :  { %v46_v19 = vsel %vm42_vm1, 1.0, %v770_v18  ;;  %v44_v20 = vsel %vm40_vm2, 1.0, %v770_v18 }
  0x85   :  { %v39_v16 = vpop.permute.xlu1 %38  ;;  %v33_v17 = vpop.permute.xlu0 %32 }
  0x86   :  { %vm43_vm3 = vcmp.eq.s32.totalorder %v27_v13, %v39_v16  ;;  %vm41_vm4 = vcmp.eq.s32.totalorder %v27_v13, %v33_v17 }
  0x87   :  { %v47_v21 = vsel %vm43_vm3, 1.0, %v770_v18  ;;  %v45_v22 = vsel %vm41_vm4, 1.0, %v770_v18 }
  0x88   :  { %v49_v23 = vpack.c.bf16 %v47_v21, %v46_v19  ;;  %v48_v24 = vpack.c.bf16 %v45_v22, %v44_v20 }
  0x8a   :  { %680 = vmatprep.mubr.msk.bf16.mxu0 %vm78_vm5, %v48_v24 }
  0x8b   :  { %681 = vmatmul.mubr.msk.bf16.vlgmr.msra.gmra.mrb[0].mxu0 %vm78_vm5, %v49_v23 }
  0x8c   :  { %701 = vmatpush3.bf16.msra.mxu0 %v736_v11 }
  0x8d   :  { %702 = vmatprep.subr.bf16.mxu0 %v738_v26 }
  0x90   :  { %703 = vmatpush3.bf16.msra.mxu0 %v738_v26 }
  0x91   :  { %716 = vmatprep.subr.bf16.mxu0 %v740_v28 }
 0x15e   :  { %v682_v29 = vpop.f32.mrb[0].mxu0 }
 0x15f   :  { %v123_v30 = vpop.f32.mrb[1].mxu0 }
 0x160   :  { %v683_v31 = vpop.f32.mrb[2].mxu0 }
 0x161   :  { %v139_v32 = vpack.c.bf16 %v683_v31, %v682_v29  ;;  %v126_v33 = vpop.f32.mrb[3].mxu0 }
 0x162   :  { %v138_v34 = vpack.c.bf16 %v126_v33, %v123_v30 }
 0x164   :  { %688 = vmatprep.mubr.msk.bf16.mxu1 %vm160_vm6, %v138_v34  ;;  %704 = vmatprep.mubr.msk.bf16.mxu0 %vm160_vm6, %v138_v34 }
 0x165   :  { %689 = vmatmul.mubr.msk.bf16.vlgmr.msra.gmra.mrb[0].mxu1 %vm160_vm6, %v139_v32  ;;  %705 = vmatmul.mubr.msk.bf16.vlgmr.msra.gmra.mrb[4].mxu0 %vm160_vm6, %v139_v32 }
 0x166   :  { %693 = vmatpush3.bf16.msra.mxu1 %v739_v27  ;;  %696 = vmatprep.mubr.msk.bf16.mxu1 %vm160_vm6, %v138_v34 }
 0x167   :  { %717 = vmatpush3.bf16.msra.mxu0 %v740_v28  ;;  %720 = vmatprep.mubr.msk.bf16.mxu0 %vm160_vm6, %v138_v34 }
 0x168   :  { %694 = vmatprep.subr.bf16.mxu1 %v741_v35  ;;  %718 = vmatprep.subr.bf16.mxu0 %v742_v36 }
 0x16a   :  { %695 = vmatpush3.bf16.msra.mxu1 %v741_v35 }
 0x16b   :  { %719 = vmatpush3.bf16.msra.mxu0 %v742_v36  ;;  %708 = vmatprep.subr.bf16.mxu1 %v743_v37 }
 0x16d   :  { %697 = vmatmul.mubr.msk.bf16.vlgmr.msra.gmra.mrb[4].mxu1 %vm160_vm6, %v139_v32 }
 0x16e   :  { %709 = vmatpush3.bf16.msra.mxu1 %v743_v37  ;;  %721 = vmatmul.mubr.msk.bf16.vlgmr.msra.gmra.mrb[8].mxu0 %vm160_vm6, %v139_v32 }
 0x16f   :  { %712 = vmatprep.mubr.msk.bf16.mxu1 %vm160_vm6, %v138_v34  ;;  %710 = vmatprep.subr.bf16.mxu1 %v744_v38 }
 0x172   :  { %711 = vmatpush3.bf16.msra.mxu1 %v744_v38 }
 0x175   :  { %713 = vmatmul.mubr.msk.bf16.vlgmr.msra.gmra.mrb[8].mxu1 %vm160_vm6, %v139_v32 }
 0x238   :  { %v690_v39 = vpop.f32.mrb[0].mxu1  ;;  %v706_v40 = vpop.f32.mrb[4].mxu0 }
 0x239   :  { %v201_v42 = vpop.f32.mrb[1].mxu1  ;;  %v377_v43 = vpop.f32.mrb[5].mxu0  ;;  %v224_v48 = vrot.slane %v690_v39, 1  ;;  %v399_v49 = vrot.slane %v706_v40, 1 }
 0x23a   :  { %v221_v44 = vrot.slane %v201_v42, 1  ;;  %v396_v45 = vrot.slane %v377_v43, 1  ;;  %v691_v46 = vpop.f32.mrb[2].mxu1  ;;  %v707_v47 = vpop.f32.mrb[6].mxu0 }
 0x23b   :  { %v226_v50 = vrot.slane %v691_v46, 1  ;;  %v401_v51 = vrot.slane %v707_v47, 1  ;;  %v204_v52 = vpop.f32.mrb[3].mxu1  ;;  %v380_v53 = vpop.f32.mrb[7].mxu0 }
 0x23c   :  { %v222_v54 = vrot.slane %v204_v52, 1  ;;  %v397_v55 = vrot.slane %v380_v53, 1 }
 0x23d   :  { %v227_v57 = vsel %vm220_vm7, %v224_v48, %v226_v50  ;;  %v233_v58 = vsel %vm220_vm7, %v226_v50, %v221_v44  ;;  %v402_v59 = vsel %vm220_vm7, %v399_v49, %v401_v51  ;;  %v408_v60 = vsel %vm220_vm7, %v401_v51, %v396_v45 }
 0x23e   :  { %v223_v61 = vsel %vm220_vm7, %v221_v44, %v222_v54  ;;  %v225_v62 = vsel %vm220_vm7, %v222_v54, %v224_v48  ;;  %v398_v63 = vsel %vm220_vm7, %v396_v45, %v397_v55  ;;  %v400_v0 = vsel %vm220_vm7, %v397_v55, %v399_v49 }
 0x240   :  { %v698_v1 = vpop.f32.mrb[4].mxu1 }
 0x241   :  { %v289_v2 = vadd.f32 %v698_v1, %v227_v57  ;;  %v722_v3 = vpop.f32.mrb[8].mxu0  ;;  %v280_v4 = vpop.f32.mrb[5].mxu1 }
 0x242   :  { %v281_v5 = vadd.f32 %v280_v4, %v223_v61  ;;  %v520_v6 = vpop.f32.mrb[9].mxu0  ;;  %v699_v7 = vpop.f32.mrb[6].mxu1  ;;  %v543_v12 = vrot.slane %v722_v3, 2 }
 0x243   :  { %v540_v8 = vrot.slane %v520_v6, 2  ;;  %v292_v9 = vadd.f32 %v699_v7, %v233_v58  ;;  %v723_v10 = vpop.f32.mrb[10].mxu0  ;;  %v283_v11 = vpop.f32.mrb[7].mxu1  ;;  %v314_v16 = vsel %vm304_vm8, %v289_v2, -inf }
 0x244   :  { %v545_v13 = vrot.slane %v723_v10, 2  ;;  %v284_v14 = vadd.f32 %v283_v11, %v225_v62  ;;  %v523_v15 = vpop.f32.mrb[11].mxu0  ;;  %v305_v17 = vsel %vm304_vm8, %v281_v5, -inf  ;;  %v645_v11 = vld [vmem:[%s909_s4] ss:$0 sm:$0xff] }
 0x245   :  { %v303_v18 = vsel %vm299_vm9, %v292_v9, -inf  ;;  %v541_v19 = vrot.slane %v523_v15, 2 }
 0x246   :  { %v315_v20 = vsel %vm304_vm8, %v303_v18, -inf  ;;  %v301_v21 = vsel %vm299_vm9, %v284_v14, -inf  ;;  %v546_v22 = vsel %vm539_vm10, %v543_v12, %v545_v13  ;;  %v552_v23 = vsel %vm539_vm10, %v545_v13, %v540_v8 }
 0x247   :  { %v316_v24 = vmax.f32 %v314_v16, %v315_v20  ;;  %v306_v25 = vsel %vm304_vm8, %v301_v21, -inf  ;;  %v542_v26 = vsel %vm539_vm10, %v540_v8, %v541_v19  ;;  %v544_v27 = vsel %vm539_vm10, %v541_v19, %v543_v12 }
 0x248   :  { %v307_v28 = vmax.f32 %v305_v17, %v306_v25  ;;  %v714_v29 = vpop.f32.mrb[8].mxu1 }
 0x249   :  { %v317_v30 = vrot.slane %v316_v24, 4  ;;  %v464_v31 = vadd.f32 %v714_v29, %v402_v59  ;;  %v455_v32 = vpop.f32.mrb[9].mxu1 }
 0x24a   :  { %v308_v33 = vrot.slane %v307_v28, 4  ;;  %v456_v34 = vadd.f32 %v455_v32, %v398_v63  ;;  %v715_v35 = vpop.f32.mrb[10].mxu1 }
 0x24b   :  { %v318_v36 = vmax.f32 %v316_v24, %v317_v30  ;;  %v555_v37 = vadd.f32 %v546_v22, %v464_v31  ;;  %v467_v38 = vadd.f32 %v715_v35, %v408_v60  ;;  %v458_v39 = vpop.f32.mrb[11].mxu1 }
 0x24c   :  { %v309_v40 = vmax.f32 %v307_v28, %v308_v33  ;;  %v553_v41 = vadd.f32 %v542_v26, %v456_v34  ;;  %v459_v42 = vadd.f32 %v458_v39, %v400_v0 }
 0x24d   :  { %v319_v43 = vrot.slane %v318_v36, 2  ;;  %v556_v44 = vadd.f32 %v552_v23, %v467_v38  ;;  %v573_v50 = vsel %vm563_vm12, %v555_v37, -inf }
 0x24e   :  { %v310_v45 = vrot.slane %v309_v40, 2  ;;  %v554_v46 = vadd.f32 %v544_v27, %v459_v42  ;;  %v564_v53 = vsel %vm563_vm12, %v553_v41, -inf }
 0x24f   :  { %v320_v47 = vmax.f32 %v318_v36, %v319_v43  ;;  %v562_v48 = vsel %vm558_vm11, %v556_v44, -inf }
 0x250   :  { %v311_v49 = vmax.f32 %v309_v40, %v310_v45  ;;  %v574_v51 = vsel %vm563_vm12, %v562_v48, -inf  ;;  %v560_v52 = vsel %vm558_vm11, %v554_v46, -inf }
 0x251   :  { %v575_v54 = vmax.f32 %v573_v50, %v574_v51  ;;  %v565_v55 = vsel %vm563_vm12, %v560_v52, -inf  ;;  %v321_v57 = vrot.slane %v320_v47, 1 }
 0x252   :  { %v566_v58 = vmax.f32 %v564_v53, %v565_v55  ;;  %v312_v59 = vrot.slane %v311_v49, 1 }
 0x253   :  { %v576_v60 = vrot.slane %v575_v54, 4  ;;  %v322_v56 = vmax.f32 %v320_v47, %v321_v57 }
 0x254   :  { %v567_v61 = vrot.slane %v566_v58, 4  ;;  %v313_v62 = vmax.f32 %v311_v49, %v312_v59 }
 0x255   :  { %v577_v63 = vmax.f32 %v575_v54, %v576_v60 }
 0x256   :  { %v568_v0 = vmax.f32 %v566_v58, %v567_v61  ;;  %v585_v1 = vsel %vm584_vm13, %v322_v56, %v313_v62 }
 0x257   :  { %v578_v2 = vrot.slane %v577_v63, 2 }
 0x258   :  { %v569_v3 = vrot.slane %v568_v0, 2 }
 0x259   :  { %v579_v4 = vmax.f32 %v577_v63, %v578_v2 }
 0x25a   :  { %v570_v5 = vmax.f32 %v568_v0, %v569_v3 }
 0x25b   :  { %v580_v6 = vrot.slane %v579_v4, 1 }
 0x25c   :  { %v571_v7 = vrot.slane %v570_v5, 1 }
 0x25d   :  { %v581_v8 = vmax.f32 %v579_v4, %v580_v6 }
 0x25e   :  { %v572_v9 = vmax.f32 %v570_v5, %v571_v7 }
 0x260   :  { %v589_v10 = vsel %vm584_vm13, %v581_v8, %v572_v9 }
 0x261   :  { %590 = vrot.lane.b32.xlu0 %v589_v10, %s771_s3 }
 0x2d3   :  { %v591_v12 = vpop.permute.xlu0 %590 }
 0x2d4   :  { %v593_v13 = vsel %vm304_vm8, %v585_v1, %v591_v12 }
 0x2d5   :  { %v601_v14 = vadd.f32 %v645_v11, %v593_v13 }
 0x2d7   :  { %v602_v15 = vmax.f32 %v601_v14, 0.0 }
 0x2d9   :  { %604 = vst.msk [vmem:[#allocation2] sm:$0x3] %vm603_vm14, %v602_v15 }
 0x2da   :  { %756 = shalt.err (!%p753_p4)
}
 0x2db   :  { %s757_s4 = scalar_lea.hbm %s910_s5, 32 }
 0x2dc   :  { %p758_p5 = scmp.ne.s32.totalorder %s910_s5, %s757_s4  ;;  %p761_p6 = scmp.lt.u32.totalorder %s757_s4, %s910_s5 }
 0x2de   :  { %p763_p7 = pnand %p761_p6, %p758_p5 }
 0x2e0   :  { %766 = shalt.err (!%p763_p7)
}
 0x2e1   :  { %614 = dma.vmem_to_hbm [thread:$0]  %s612_s29, 32, %s910_s5, [#allocation3]  }
 0x2e2   :  { %767 = dma.done.wait [#allocation3], 32  }
 0x2e3   :  { %768 = vsyncadd [#allocation3], 4294967264 }
 0x2e4   :  { %618 = vsyncpa [#allocation3], 1 }

</bundles_post_ra>
